<compile_context>
chip_gen: v7x
topology: tpu7x:2x2x1
jax: 0.10.0
libtpu: 0.0.40
codegen_flags: <defaults>
</compile_context>

<pallas_src>
import jax
import jax.numpy as jnp
import numpy as np
from jax.experimental import pallas as pl
from jax.experimental.pallas import tpu as pltpu


def multi_step_loss_pallas(state, actions, target_states, params, discount=0.99):
    """Pallas implementation of MultiStepLoss.forward(model, state, actions, targets)."""
    w1s, w1a, b1, w2, b2, w3, b3 = params

    B, S = state.shape
    # Faithful to the PyTorch reference: num_steps comes from state.shape[1].
    num_steps = state.shape[1]
    T, A = actions.shape[1], actions.shape[2]
    H = w2.shape[0]

    # Explicit shape contract (the reference silently assumes this).
    assert actions.shape[0] == B and target_states.shape[0] == B
    assert T >= num_steps and target_states.shape[1] >= num_steps
    assert target_states.shape[2] == S

    # Fuse the two first-layer weights once at trace time (free).
    w1 = jnp.concatenate([w1s, w1a], axis=0).astype(jnp.float32)        # (S+A, H)

    # Lane-dense, transpose-free layouts: contiguous reshapes only.
    actions_flat = actions.reshape(B, T * A).astype(jnp.float32)        # (B, T*A)
    targets_flat = target_states.reshape(
        B, target_states.shape[1] * S).astype(jnp.float32)              # (B, T*S)

    inv_n = float(1.0 / (B * S))  # MSE 'mean' normalizer, compile-time constant

    def kernel(state_ref, actions_ref, targets_ref,
               w1_ref, b1_ref, w2_ref, b2_ref, w3_ref, b3_ref,
               out_ref):
        # Hoist weight loads and bias broadcasts out of the unrolled rollout.
        w1v = w1_ref[...]
        w2v = w2_ref[...]
        w3v = w3_ref[...]
        b1v = jnp.broadcast_to(b1_ref[...], (B, H))
        b2v = jnp.broadcast_to(b2_ref[...], (B, H))
        b3v = jnp.broadcast_to(b3_ref[...], (B, S))

        s = state_ref[...]
        acc = jnp.zeros((B, S), jnp.float32)   # vector loss accumulator

        # Sequential step->step dependence: statically unrolled rollout (T=8).
        for step in range(num_steps):
            a = actions_ref[:, step * A:(step + 1) * A]
            sa = jnp.concatenate([s, a], axis=-1)                       # (B, S+A)
            h1 = jnp.maximum(
                jnp.dot(sa, w1v, preferred_element_type=jnp.float32) + b1v, 0.0)
            h2 = jnp.maximum(
                jnp.dot(h1, w2v, preferred_element_type=jnp.float32) + b2v, 0.0)
            s = jnp.dot(h2, w3v, preferred_element_type=jnp.float32) + b3v
            diff = s - targets_ref[:, step * S:(step + 1) * S]
            # discount baked in as a compile-time constant per step
            acc = acc + jnp.float32(discount ** step) * (diff * diff)

        # Single cross-lane/sublane reduction + one scale at the very end.
        out_ref[0] = jnp.sum(acc) * jnp.float32(inv_n)

    out = pl.pallas_call(
        kernel,
        out_shape=jax.ShapeDtypeStruct((1,), jnp.float32),
        in_specs=[pl.BlockSpec(memory_space=pltpu.MemorySpace.VMEM)] * 9,
        out_specs=pl.BlockSpec(memory_space=pltpu.MemorySpace.SMEM),
    )(state.astype(jnp.float32), actions_flat, targets_flat,
      w1, b1.astype(jnp.float32), w2.astype(jnp.float32),
      b2.astype(jnp.float32), w3.astype(jnp.float32), b3.astype(jnp.float32))
    return out[0]


def multi_step_loss_reference(state, actions, target_states, params, discount=0.99):
    """Pure-JAX reference mirroring the PyTorch forward exactly."""
    w1s, w1a, b1, w2, b2, w3, b3 = params
    total = jnp.float32(0.0)
    s = state.astype(jnp.float32)
    num_steps = state.shape[1]
    for step in range(num_steps):
        a = actions[:, step, :].astype(jnp.float32)
        h1 = jax.nn.relu(s @ w1s + a @ w1a + b1)
        h2 = jax.nn.relu(h1 @ w2 + b2)
        s = h2 @ w3 + b3
        diff = s - target_states[:, step, :].astype(jnp.float32)
        total = total + jnp.float32(discount ** step) * jnp.mean(diff * diff)
    return total


def init_params(key, state_dim, action_dim, hidden):
    ks = jax.random.split(key, 7)
    scale = 0.1
    w1s = scale * jax.random.normal(ks[0], (state_dim, hidden), jnp.float32)
    w1a = scale * jax.random.normal(ks[1], (action_dim, hidden), jnp.float32)
    b1 = scale * jax.random.normal(ks[2], (1, hidden), jnp.float32)
    w2 = scale * jax.random.normal(ks[3], (hidden, hidden), jnp.float32)
    b2 = scale * jax.random.normal(ks[4], (1, hidden), jnp.float32)
    w3 = scale * jax.random.normal(ks[5], (hidden, state_dim), jnp.float32)
    b3 = scale * jax.random.normal(ks[6], (1, state_dim), jnp.float32)
    return (w1s, w1a, b1, w2, b2, w3, b3)


if __name__ == "__main__":
    # num_steps = state.shape[1] in the reference, so state_dim == num_steps here.
    B, S, A, H = 8, 8, 8, 32
    T = S  # num_steps

    key = jax.random.PRNGKey(0)
    k_state, k_act, k_tgt, k_params = jax.random.split(key, 4)

    state = jax.random.normal(k_state, (B, S), jnp.float32)
    actions = jax.random.normal(k_act, (B, T, A), jnp.float32)
    target_states = jax.random.normal(k_tgt, (B, T, S), jnp.float32)
    params = init_params(k_params, S, A, H)

    loss_pallas = jax.block_until_ready(
        multi_step_loss_pallas(state, actions, target_states, params, discount=0.99))
    loss_ref = jax.block_until_ready(
        multi_step_loss_reference(state, actions, target_states, params, discount=0.99))

    np.testing.assert_allclose(np.asarray(loss_pallas), np.asarray(loss_ref),
                               rtol=1e-5, atol=1e-5)
    print("KERNEL_OK")
</pallas_src>

<mosaic_0001>
module attributes {stable_mosaic.version = 11 : i64} {
  func.func @kernel(%arg0: memref<8x8xf32, #tpu.memory_space<vmem>>, %arg1: memref<8x64xf32, #tpu.memory_space<vmem>>, %arg2: memref<8x64xf32, #tpu.memory_space<vmem>>, %arg3: memref<16x32xf32, #tpu.memory_space<vmem>>, %arg4: memref<1x32xf32, #tpu.memory_space<vmem>>, %arg5: memref<32x32xf32, #tpu.memory_space<vmem>>, %arg6: memref<1x32xf32, #tpu.memory_space<vmem>>, %arg7: memref<32x8xf32, #tpu.memory_space<vmem>>, %arg8: memref<1x8xf32, #tpu.memory_space<vmem>>, %arg9: memref<1xf32, #tpu.memory_space<smem>>) attributes {dimension_semantics = [], scalar_prefetch = 0 : i64, scratch_operands = 0 : i64, tpu.core_type = #tpu.core_type<tc>} {
    %c0 = arith.constant 0 : index
    %c0_0 = arith.constant 0 : index
    %0 = vector.load %arg3[%c0, %c0_0] : memref<16x32xf32, #tpu.memory_space<vmem>>, vector<16x32xf32>
    %c0_1 = arith.constant 0 : index
    %c0_2 = arith.constant 0 : index
    %1 = vector.load %arg5[%c0_1, %c0_2] : memref<32x32xf32, #tpu.memory_space<vmem>>, vector<32x32xf32>
    %c0_3 = arith.constant 0 : index
    %c0_4 = arith.constant 0 : index
    %2 = vector.load %arg7[%c0_3, %c0_4] : memref<32x8xf32, #tpu.memory_space<vmem>>, vector<32x8xf32>
    %c0_5 = arith.constant 0 : index
    %c0_6 = arith.constant 0 : index
    %3 = vector.load %arg4[%c0_5, %c0_6] : memref<1x32xf32, #tpu.memory_space<vmem>>, vector<1x32xf32>
    %4 = vector.shape_cast %3 : vector<1x32xf32> to vector<1x32xf32>
    %5 = vector.broadcast %4 : vector<1x32xf32> to vector<8x32xf32>
    %c0_7 = arith.constant 0 : index
    %c0_8 = arith.constant 0 : index
    %6 = vector.load %arg6[%c0_7, %c0_8] : memref<1x32xf32, #tpu.memory_space<vmem>>, vector<1x32xf32>
    %7 = vector.shape_cast %6 : vector<1x32xf32> to vector<1x32xf32>
    %8 = vector.broadcast %7 : vector<1x32xf32> to vector<8x32xf32>
    %c0_9 = arith.constant 0 : index
    %c0_10 = arith.constant 0 : index
    %9 = vector.load %arg8[%c0_9, %c0_10] : memref<1x8xf32, #tpu.memory_space<vmem>>, vector<1x8xf32>
    %10 = vector.shape_cast %9 : vector<1x8xf32> to vector<1x8xf32>
    %11 = vector.broadcast %10 : vector<1x8xf32> to vector<8x8xf32>
    %c0_11 = arith.constant 0 : index
    %c0_12 = arith.constant 0 : index
    %12 = vector.load %arg0[%c0_11, %c0_12] : memref<8x8xf32, #tpu.memory_space<vmem>>, vector<8x8xf32>
    %cst = arith.constant 0.000000e+00 : f32
    %13 = vector.broadcast %cst : f32 to vector<8x8xf32>
    %c0_13 = arith.constant 0 : index
    %c0_14 = arith.constant 0 : index
    %14 = vector.load %arg1[%c0_13, %c0_14] : memref<8x64xf32, #tpu.memory_space<vmem>>, vector<8x8xf32>
    %15 = tpu.concatenate %12, %14 in 1 : vector<8x8xf32>, vector<8x8xf32> -> vector<8x16xf32>
    %cst_15 = arith.constant dense<0.000000e+00> : vector<8x32xf32>
    %16 = tpu.matmul %15, %0, %cst_15 {dimension_numbers = #tpu.dot_dimension_numbers<[1], [0], [0], [1], [0, 0, 1, 1], [], []>} : vector<8x16xf32>, vector<16x32xf32>, vector<8x32xf32> -> vector<8x32xf32>
    %17 = arith.addf %16, %5 : vector<8x32xf32>
    %cst_16 = arith.constant 0.000000e+00 : f32
    %18 = vector.broadcast %cst_16 : f32 to vector<8x32xf32>
    %19 = arith.maximumf %17, %18 : vector<8x32xf32>
    %cst_17 = arith.constant dense<0.000000e+00> : vector<8x32xf32>
    %20 = tpu.matmul %19, %1, %cst_17 {dimension_numbers = #tpu.dot_dimension_numbers<[1], [0], [0], [1], [0, 0, 1, 1], [], []>} : vector<8x32xf32>, vector<32x32xf32>, vector<8x32xf32> -> vector<8x32xf32>
    %21 = arith.addf %20, %8 : vector<8x32xf32>
    %cst_18 = arith.constant 0.000000e+00 : f32
    %22 = vector.broadcast %cst_18 : f32 to vector<8x32xf32>
    %23 = arith.maximumf %21, %22 : vector<8x32xf32>
    %cst_19 = arith.constant dense<0.000000e+00> : vector<8x8xf32>
    %24 = tpu.matmul %23, %2, %cst_19 {dimension_numbers = #tpu.dot_dimension_numbers<[1], [0], [0], [1], [0, 0, 1, 1], [], []>} : vector<8x32xf32>, vector<32x8xf32>, vector<8x8xf32> -> vector<8x8xf32>
    %25 = arith.addf %24, %11 : vector<8x8xf32>
    %c0_20 = arith.constant 0 : index
    %c0_21 = arith.constant 0 : index
    %26 = vector.load %arg2[%c0_20, %c0_21] : memref<8x64xf32, #tpu.memory_space<vmem>>, vector<8x8xf32>
    %27 = arith.subf %25, %26 : vector<8x8xf32>
    %28 = arith.mulf %27, %27 : vector<8x8xf32>
    %cst_22 = arith.constant 1.000000e+00 : f32
    %29 = vector.broadcast %cst_22 : f32 to vector<8x8xf32>
    %30 = arith.mulf %29, %28 : vector<8x8xf32>
    %31 = arith.addf %13, %30 : vector<8x8xf32>
    %c0_23 = arith.constant 0 : index
    %c8 = arith.constant 8 : index
    %32 = vector.load %arg1[%c0_23, %c8] : memref<8x64xf32, #tpu.memory_space<vmem>>, vector<8x8xf32>
    %33 = tpu.concatenate %25, %32 in 1 : vector<8x8xf32>, vector<8x8xf32> -> vector<8x16xf32>
    %cst_24 = arith.constant dense<0.000000e+00> : vector<8x32xf32>
    %34 = tpu.matmul %33, %0, %cst_24 {dimension_numbers = #tpu.dot_dimension_numbers<[1], [0], [0], [1], [0, 0, 1, 1], [], []>} : vector<8x16xf32>, vector<16x32xf32>, vector<8x32xf32> -> vector<8x32xf32>
    %35 = arith.addf %34, %5 : vector<8x32xf32>
    %cst_25 = arith.constant 0.000000e+00 : f32
    %36 = vector.broadcast %cst_25 : f32 to vector<8x32xf32>
    %37 = arith.maximumf %35, %36 : vector<8x32xf32>
    %cst_26 = arith.constant dense<0.000000e+00> : vector<8x32xf32>
    %38 = tpu.matmul %37, %1, %cst_26 {dimension_numbers = #tpu.dot_dimension_numbers<[1], [0], [0], [1], [0, 0, 1, 1], [], []>} : vector<8x32xf32>, vector<32x32xf32>, vector<8x32xf32> -> vector<8x32xf32>
    %39 = arith.addf %38, %8 : vector<8x32xf32>
    %cst_27 = arith.constant 0.000000e+00 : f32
    %40 = vector.broadcast %cst_27 : f32 to vector<8x32xf32>
    %41 = arith.maximumf %39, %40 : vector<8x32xf32>
    %cst_28 = arith.constant dense<0.000000e+00> : vector<8x8xf32>
    %42 = tpu.matmul %41, %2, %cst_28 {dimension_numbers = #tpu.dot_dimension_numbers<[1], [0], [0], [1], [0, 0, 1, 1], [], []>} : vector<8x32xf32>, vector<32x8xf32>, vector<8x8xf32> -> vector<8x8xf32>
    %43 = arith.addf %42, %11 : vector<8x8xf32>
    %c0_29 = arith.constant 0 : index
    %c8_30 = arith.constant 8 : index
    %44 = vector.load %arg2[%c0_29, %c8_30] : memref<8x64xf32, #tpu.memory_space<vmem>>, vector<8x8xf32>
    %45 = arith.subf %43, %44 : vector<8x8xf32>
    %46 = arith.mulf %45, %45 : vector<8x8xf32>
    %cst_31 = arith.constant 9.900000e-01 : f32
    %47 = vector.broadcast %cst_31 : f32 to vector<8x8xf32>
    %48 = arith.mulf %47, %46 : vector<8x8xf32>
    %49 = arith.addf %31, %48 : vector<8x8xf32>
    %c0_32 = arith.constant 0 : index
    %c16 = arith.constant 16 : index
    %50 = vector.load %arg1[%c0_32, %c16] : memref<8x64xf32, #tpu.memory_space<vmem>>, vector<8x8xf32>
    %51 = tpu.concatenate %43, %50 in 1 : vector<8x8xf32>, vector<8x8xf32> -> vector<8x16xf32>
    %cst_33 = arith.constant dense<0.000000e+00> : vector<8x32xf32>
    %52 = tpu.matmul %51, %0, %cst_33 {dimension_numbers = #tpu.dot_dimension_numbers<[1], [0], [0], [1], [0, 0, 1, 1], [], []>} : vector<8x16xf32>, vector<16x32xf32>, vector<8x32xf32> -> vector<8x32xf32>
    %53 = arith.addf %52, %5 : vector<8x32xf32>
    %cst_34 = arith.constant 0.000000e+00 : f32
    %54 = vector.broadcast %cst_34 : f32 to vector<8x32xf32>
    %55 = arith.maximumf %53, %54 : vector<8x32xf32>
    %cst_35 = arith.constant dense<0.000000e+00> : vector<8x32xf32>
    %56 = tpu.matmul %55, %1, %cst_35 {dimension_numbers = #tpu.dot_dimension_numbers<[1], [0], [0], [1], [0, 0, 1, 1], [], []>} : vector<8x32xf32>, vector<32x32xf32>, vector<8x32xf32> -> vector<8x32xf32>
    %57 = arith.addf %56, %8 : vector<8x32xf32>
    %cst_36 = arith.constant 0.000000e+00 : f32
    %58 = vector.broadcast %cst_36 : f32 to vector<8x32xf32>
    %59 = arith.maximumf %57, %58 : vector<8x32xf32>
    %cst_37 = arith.constant dense<0.000000e+00> : vector<8x8xf32>
    %60 = tpu.matmul %59, %2, %cst_37 {dimension_numbers = #tpu.dot_dimension_numbers<[1], [0], [0], [1], [0, 0, 1, 1], [], []>} : vector<8x32xf32>, vector<32x8xf32>, vector<8x8xf32> -> vector<8x8xf32>
    %61 = arith.addf %60, %11 : vector<8x8xf32>
    %c0_38 = arith.constant 0 : index
    %c16_39 = arith.constant 16 : index
    %62 = vector.load %arg2[%c0_38, %c16_39] : memref<8x64xf32, #tpu.memory_space<vmem>>, vector<8x8xf32>
    %63 = arith.subf %61, %62 : vector<8x8xf32>
    %64 = arith.mulf %63, %63 : vector<8x8xf32>
    %cst_40 = arith.constant 0.980099976 : f32
    %65 = vector.broadcast %cst_40 : f32 to vector<8x8xf32>
    %66 = arith.mulf %65, %64 : vector<8x8xf32>
    %67 = arith.addf %49, %66 : vector<8x8xf32>
    %c0_41 = arith.constant 0 : index
    %c24 = arith.constant 24 : index
    %68 = vector.load %arg1[%c0_41, %c24] : memref<8x64xf32, #tpu.memory_space<vmem>>, vector<8x8xf32>
    %69 = tpu.concatenate %61, %68 in 1 : vector<8x8xf32>, vector<8x8xf32> -> vector<8x16xf32>
    %cst_42 = arith.constant dense<0.000000e+00> : vector<8x32xf32>
    %70 = tpu.matmul %69, %0, %cst_42 {dimension_numbers = #tpu.dot_dimension_numbers<[1], [0], [0], [1], [0, 0, 1, 1], [], []>} : vector<8x16xf32>, vector<16x32xf32>, vector<8x32xf32> -> vector<8x32xf32>
    %71 = arith.addf %70, %5 : vector<8x32xf32>
    %cst_43 = arith.constant 0.000000e+00 : f32
    %72 = vector.broadcast %cst_43 : f32 to vector<8x32xf32>
    %73 = arith.maximumf %71, %72 : vector<8x32xf32>
    %cst_44 = arith.constant dense<0.000000e+00> : vector<8x32xf32>
    %74 = tpu.matmul %73, %1, %cst_44 {dimension_numbers = #tpu.dot_dimension_numbers<[1], [0], [0], [1], [0, 0, 1, 1], [], []>} : vector<8x32xf32>, vector<32x32xf32>, vector<8x32xf32> -> vector<8x32xf32>
    %75 = arith.addf %74, %8 : vector<8x32xf32>
    %cst_45 = arith.constant 0.000000e+00 : f32
    %76 = vector.broadcast %cst_45 : f32 to vector<8x32xf32>
    %77 = arith.maximumf %75, %76 : vector<8x32xf32>
    %cst_46 = arith.constant dense<0.000000e+00> : vector<8x8xf32>
    %78 = tpu.matmul %77, %2, %cst_46 {dimension_numbers = #tpu.dot_dimension_numbers<[1], [0], [0], [1], [0, 0, 1, 1], [], []>} : vector<8x32xf32>, vector<32x8xf32>, vector<8x8xf32> -> vector<8x8xf32>
    %79 = arith.addf %78, %11 : vector<8x8xf32>
    %c0_47 = arith.constant 0 : index
    %c24_48 = arith.constant 24 : index
    %80 = vector.load %arg2[%c0_47, %c24_48] : memref<8x64xf32, #tpu.memory_space<vmem>>, vector<8x8xf32>
    %81 = arith.subf %79, %80 : vector<8x8xf32>
    %82 = arith.mulf %81, %81 : vector<8x8xf32>
    %cst_49 = arith.constant 9.702990e-01 : f32
    %83 = vector.broadcast %cst_49 : f32 to vector<8x8xf32>
    %84 = arith.mulf %83, %82 : vector<8x8xf32>
    %85 = arith.addf %67, %84 : vector<8x8xf32>
    %c0_50 = arith.constant 0 : index
    %c32 = arith.constant 32 : index
    %86 = vector.load %arg1[%c0_50, %c32] : memref<8x64xf32, #tpu.memory_space<vmem>>, vector<8x8xf32>
    %87 = tpu.concatenate %79, %86 in 1 : vector<8x8xf32>, vector<8x8xf32> -> vector<8x16xf32>
    %cst_51 = arith.constant dense<0.000000e+00> : vector<8x32xf32>
    %88 = tpu.matmul %87, %0, %cst_51 {dimension_numbers = #tpu.dot_dimension_numbers<[1], [0], [0], [1], [0, 0, 1, 1], [], []>} : vector<8x16xf32>, vector<16x32xf32>, vector<8x32xf32> -> vector<8x32xf32>
    %89 = arith.addf %88, %5 : vector<8x32xf32>
    %cst_52 = arith.constant 0.000000e+00 : f32
    %90 = vector.broadcast %cst_52 : f32 to vector<8x32xf32>
    %91 = arith.maximumf %89, %90 : vector<8x32xf32>
    %cst_53 = arith.constant dense<0.000000e+00> : vector<8x32xf32>
    %92 = tpu.matmul %91, %1, %cst_53 {dimension_numbers = #tpu.dot_dimension_numbers<[1], [0], [0], [1], [0, 0, 1, 1], [], []>} : vector<8x32xf32>, vector<32x32xf32>, vector<8x32xf32> -> vector<8x32xf32>
    %93 = arith.addf %92, %8 : vector<8x32xf32>
    %cst_54 = arith.constant 0.000000e+00 : f32
    %94 = vector.broadcast %cst_54 : f32 to vector<8x32xf32>
    %95 = arith.maximumf %93, %94 : vector<8x32xf32>
    %cst_55 = arith.constant dense<0.000000e+00> : vector<8x8xf32>
    %96 = tpu.matmul %95, %2, %cst_55 {dimension_numbers = #tpu.dot_dimension_numbers<[1], [0], [0], [1], [0, 0, 1, 1], [], []>} : vector<8x32xf32>, vector<32x8xf32>, vector<8x8xf32> -> vector<8x8xf32>
    %97 = arith.addf %96, %11 : vector<8x8xf32>
    %c0_56 = arith.constant 0 : index
    %c32_57 = arith.constant 32 : index
    %98 = vector.load %arg2[%c0_56, %c32_57] : memref<8x64xf32, #tpu.memory_space<vmem>>, vector<8x8xf32>
    %99 = arith.subf %97, %98 : vector<8x8xf32>
    %100 = arith.mulf %99, %99 : vector<8x8xf32>
    %cst_58 = arith.constant 9.605960e-01 : f32
    %101 = vector.broadcast %cst_58 : f32 to vector<8x8xf32>
    %102 = arith.mulf %101, %100 : vector<8x8xf32>
    %103 = arith.addf %85, %102 : vector<8x8xf32>
    %c0_59 = arith.constant 0 : index
    %c40 = arith.constant 40 : index
    %104 = vector.load %arg1[%c0_59, %c40] : memref<8x64xf32, #tpu.memory_space<vmem>>, vector<8x8xf32>
    %105 = tpu.concatenate %97, %104 in 1 : vector<8x8xf32>, vector<8x8xf32> -> vector<8x16xf32>
    %cst_60 = arith.constant dense<0.000000e+00> : vector<8x32xf32>
    %106 = tpu.matmul %105, %0, %cst_60 {dimension_numbers = #tpu.dot_dimension_numbers<[1], [0], [0], [1], [0, 0, 1, 1], [], []>} : vector<8x16xf32>, vector<16x32xf32>, vector<8x32xf32> -> vector<8x32xf32>
    %107 = arith.addf %106, %5 : vector<8x32xf32>
    %cst_61 = arith.constant 0.000000e+00 : f32
    %108 = vector.broadcast %cst_61 : f32 to vector<8x32xf32>
    %109 = arith.maximumf %107, %108 : vector<8x32xf32>
    %cst_62 = arith.constant dense<0.000000e+00> : vector<8x32xf32>
    %110 = tpu.matmul %109, %1, %cst_62 {dimension_numbers = #tpu.dot_dimension_numbers<[1], [0], [0], [1], [0, 0, 1, 1], [], []>} : vector<8x32xf32>, vector<32x32xf32>, vector<8x32xf32> -> vector<8x32xf32>
    %111 = arith.addf %110, %8 : vector<8x32xf32>
    %cst_63 = arith.constant 0.000000e+00 : f32
    %112 = vector.broadcast %cst_63 : f32 to vector<8x32xf32>
    %113 = arith.maximumf %111, %112 : vector<8x32xf32>
    %cst_64 = arith.constant dense<0.000000e+00> : vector<8x8xf32>
    %114 = tpu.matmul %113, %2, %cst_64 {dimension_numbers = #tpu.dot_dimension_numbers<[1], [0], [0], [1], [0, 0, 1, 1], [], []>} : vector<8x32xf32>, vector<32x8xf32>, vector<8x8xf32> -> vector<8x8xf32>
    %115 = arith.addf %114, %11 : vector<8x8xf32>
    %c0_65 = arith.constant 0 : index
    %c40_66 = arith.constant 40 : index
    %116 = vector.load %arg2[%c0_65, %c40_66] : memref<8x64xf32, #tpu.memory_space<vmem>>, vector<8x8xf32>
    %117 = arith.subf %115, %116 : vector<8x8xf32>
    %118 = arith.mulf %117, %117 : vector<8x8xf32>
    %cst_67 = arith.constant 9.509900e-01 : f32
    %119 = vector.broadcast %cst_67 : f32 to vector<8x8xf32>
    %120 = arith.mulf %119, %118 : vector<8x8xf32>
    %121 = arith.addf %103, %120 : vector<8x8xf32>
    %c0_68 = arith.constant 0 : index
    %c48 = arith.constant 48 : index
    %122 = vector.load %arg1[%c0_68, %c48] : memref<8x64xf32, #tpu.memory_space<vmem>>, vector<8x8xf32>
    %123 = tpu.concatenate %115, %122 in 1 : vector<8x8xf32>, vector<8x8xf32> -> vector<8x16xf32>
    %cst_69 = arith.constant dense<0.000000e+00> : vector<8x32xf32>
    %124 = tpu.matmul %123, %0, %cst_69 {dimension_numbers = #tpu.dot_dimension_numbers<[1], [0], [0], [1], [0, 0, 1, 1], [], []>} : vector<8x16xf32>, vector<16x32xf32>, vector<8x32xf32> -> vector<8x32xf32>
    %125 = arith.addf %124, %5 : vector<8x32xf32>
    %cst_70 = arith.constant 0.000000e+00 : f32
    %126 = vector.broadcast %cst_70 : f32 to vector<8x32xf32>
    %127 = arith.maximumf %125, %126 : vector<8x32xf32>
    %cst_71 = arith.constant dense<0.000000e+00> : vector<8x32xf32>
    %128 = tpu.matmul %127, %1, %cst_71 {dimension_numbers = #tpu.dot_dimension_numbers<[1], [0], [0], [1], [0, 0, 1, 1], [], []>} : vector<8x32xf32>, vector<32x32xf32>, vector<8x32xf32> -> vector<8x32xf32>
    %129 = arith.addf %128, %8 : vector<8x32xf32>
    %cst_72 = arith.constant 0.000000e+00 : f32
    %130 = vector.broadcast %cst_72 : f32 to vector<8x32xf32>
    %131 = arith.maximumf %129, %130 : vector<8x32xf32>
    %cst_73 = arith.constant dense<0.000000e+00> : vector<8x8xf32>
    %132 = tpu.matmul %131, %2, %cst_73 {dimension_numbers = #tpu.dot_dimension_numbers<[1], [0], [0], [1], [0, 0, 1, 1], [], []>} : vector<8x32xf32>, vector<32x8xf32>, vector<8x8xf32> -> vector<8x8xf32>
    %133 = arith.addf %132, %11 : vector<8x8xf32>
    %c0_74 = arith.constant 0 : index
    %c48_75 = arith.constant 48 : index
    %134 = vector.load %arg2[%c0_74, %c48_75] : memref<8x64xf32, #tpu.memory_space<vmem>>, vector<8x8xf32>
    %135 = arith.subf %133, %134 : vector<8x8xf32>
    %136 = arith.mulf %135, %135 : vector<8x8xf32>
    %cst_76 = arith.constant 0.941480159 : f32
    %137 = vector.broadcast %cst_76 : f32 to vector<8x8xf32>
    %138 = arith.mulf %137, %136 : vector<8x8xf32>
    %139 = arith.addf %121, %138 : vector<8x8xf32>
    %c0_77 = arith.constant 0 : index
    %c56 = arith.constant 56 : index
    %140 = vector.load %arg1[%c0_77, %c56] : memref<8x64xf32, #tpu.memory_space<vmem>>, vector<8x8xf32>
    %141 = tpu.concatenate %133, %140 in 1 : vector<8x8xf32>, vector<8x8xf32> -> vector<8x16xf32>
    %cst_78 = arith.constant dense<0.000000e+00> : vector<8x32xf32>
    %142 = tpu.matmul %141, %0, %cst_78 {dimension_numbers = #tpu.dot_dimension_numbers<[1], [0], [0], [1], [0, 0, 1, 1], [], []>} : vector<8x16xf32>, vector<16x32xf32>, vector<8x32xf32> -> vector<8x32xf32>
    %143 = arith.addf %142, %5 : vector<8x32xf32>
    %cst_79 = arith.constant 0.000000e+00 : f32
    %144 = vector.broadcast %cst_79 : f32 to vector<8x32xf32>
    %145 = arith.maximumf %143, %144 : vector<8x32xf32>
    %cst_80 = arith.constant dense<0.000000e+00> : vector<8x32xf32>
    %146 = tpu.matmul %145, %1, %cst_80 {dimension_numbers = #tpu.dot_dimension_numbers<[1], [0], [0], [1], [0, 0, 1, 1], [], []>} : vector<8x32xf32>, vector<32x32xf32>, vector<8x32xf32> -> vector<8x32xf32>
    %147 = arith.addf %146, %8 : vector<8x32xf32>
    %cst_81 = arith.constant 0.000000e+00 : f32
    %148 = vector.broadcast %cst_81 : f32 to vector<8x32xf32>
    %149 = arith.maximumf %147, %148 : vector<8x32xf32>
    %cst_82 = arith.constant dense<0.000000e+00> : vector<8x8xf32>
    %150 = tpu.matmul %149, %2, %cst_82 {dimension_numbers = #tpu.dot_dimension_numbers<[1], [0], [0], [1], [0, 0, 1, 1], [], []>} : vector<8x32xf32>, vector<32x8xf32>, vector<8x8xf32> -> vector<8x8xf32>
    %151 = arith.addf %150, %11 : vector<8x8xf32>
    %c0_83 = arith.constant 0 : index
    %c56_84 = arith.constant 56 : index
    %152 = vector.load %arg2[%c0_83, %c56_84] : memref<8x64xf32, #tpu.memory_space<vmem>>, vector<8x8xf32>
    %153 = arith.subf %151, %152 : vector<8x8xf32>
    %154 = arith.mulf %153, %153 : vector<8x8xf32>
    %cst_85 = arith.constant 0.932065367 : f32
    %155 = vector.broadcast %cst_85 : f32 to vector<8x8xf32>
    %156 = arith.mulf %155, %154 : vector<8x8xf32>
    %157 = arith.addf %139, %156 : vector<8x8xf32>
    %158 = vector.shape_cast %157 : vector<8x8xf32> to vector<1x8x8xf32>
    %cst_86 = arith.constant dense<0.000000e+00> : vector<1xf32>
    %159 = vector.multi_reduction <add>, %158, %cst_86 [1, 2] : vector<1x8x8xf32> to vector<1xf32>
    %160 = vector.shape_cast %159 : vector<1xf32> to vector<1x1x1xf32>
    %161 = vector.extract %160[0, 0, 0] : f32 from vector<1x1x1xf32>
    %cst_87 = arith.constant 1.562500e-02 : f32
    %162 = arith.mulf %161, %cst_87 : f32
    %c0_88 = arith.constant 0 : index
    %163 = memref.load %arg9[%c0_88] : memref<1xf32, #tpu.memory_space<smem>>
    memref.store %162, %arg9[%c0_88] : memref<1xf32, #tpu.memory_space<smem>>
    return
  }
}

</mosaic_0001>

<bundles_post_ra>
// kernel: tpu_custom_call.1
= control target key start
LH: loop header
LB: loop body
LE: loop exit
PB: predicated region body
PF: predicated region fallthrough
CT: control target
= control target key end

     0   :  { %14 = vsyncpa [#allocation3], 0  ;;  %s2953_s0 = inlined_call_operand.hbm [shape: f32[8,8], index: 0, kind: input, shape index: {}]   ;;  %s2954_s1 = inlined_call_operand.hbm [shape: f32[8,64], index: 1, kind: input, shape index: {}]   ;;  %s2955_s2 = inlined_call_operand.hbm [shape: f32[8,64], index: 2, kind: input, shape index: {}]   ;;  %s2956_s3 = inlined_call_operand.vmem [shape: f32[16,32], index: 3, kind: input, shape index: {}]   ;;  %s2957_s4 = inlined_call_operand.vmem [shape: f32[1,32], index: 4, kind: input, shape index: {}]   ;;  %s2958_s5 = inlined_call_operand.vmem [shape: f32[32,32], index: 5, kind: input, shape index: {}]   ;;  %s2959_s6 = inlined_call_operand.vmem [shape: f32[1,32], index: 6, kind: input, shape index: {}]   ;;  %s2960_s7 = inlined_call_operand.vmem [shape: f32[32,8], index: 7, kind: input, shape index: {}]   ;;  %s2961_s8 = inlined_call_operand.vmem [shape: f32[1,8], index: 8, kind: input, shape index: {}]   ;;  %s2962_s9 = inlined_call_operand.hbm [shape: f32[1], index: 9, kind: output, shape index: {}]  }
   0x1   :  { %15 = vsyncpa [#allocation6], 0 }
   0x2   :  { %16 = vsyncpa [#allocation4], 0  ;;  %s2566_s30 = smov [#allocation5]   ;;  %s2567_s11 = smov [#allocation2]  }
   0x3   :  { %s33_s10 = sshll.u32 %s2566_s30, 4  ;;  %s23_s12 = sshll.u32 %s2567_s11, 4  ;;  %s34_s10 = int_to_ptr.vmem [resolvable:$true] %s33_s10  ;;  %s24_s12 = int_to_ptr.vmem [resolvable:$true] %s23_s12 }
   0x4   :  { %s2484_s15 = scalar_lea.hbm %s2954_s1, 128 }
   0x5   :  { %p2485_p0 = scmp.ne.s32.totalorder %s2954_s1, %s2484_s15  ;;  %p2488_p1 = scmp.lt.u32.totalorder %s2484_s15, %s2954_s1 }
   0x7   :  { %p2490_p2 = pnand %p2488_p1, %p2485_p0 }
   0x9   :  { %2493 = shalt.err (!%p2490_p2)
}
   0xa   :  { %s2494_s20 = scalar_lea.vmem %s34_s10, 128  ;;  %p2499_p4 = scmp.lt.s32.totalorder %s34_s10, %s34_s10 }
   0xb   :  { %p2495_p3 = scmp.ne.s32.totalorder %s34_s10, %s2494_s20  ;;  %p2500_p5 = scmp.lt.s32.totalorder %s2494_s20, %s2494_s20 }
   0xd   :  { %p2501_p6 = por %p2500_p5, %p2499_p4 }
   0xf   :  { %p2502_p7 = pnand %p2501_p6, %p2495_p3 }
  0x11   :  { %2505 = shalt.err (!%p2502_p7)
}
  0x12   :  { %36 = dma.hbm_to_vmem [thread:$0]  %s2954_s1, 128, %s34_s10, [#allocation6]  }
  0x13   :  { %s2506_s25 = scalar_lea.hbm %s2953_s0, 128 }
  0x14   :  { %p2507_p8 = scmp.ne.s32.totalorder %s2953_s0, %s2506_s25  ;;  %p2510_p9 = scmp.lt.u32.totalorder %s2506_s25, %s2953_s0 }
  0x16   :  { %p2512_p10 = pnand %p2510_p9, %p2507_p8 }
  0x18   :  { %2515 = shalt.err (!%p2512_p10)
}
  0x19   :  { %s2516_s30 = scalar_lea.vmem %s24_s12, 128  ;;  %p2521_p12 = scmp.lt.s32.totalorder %s24_s12, %s24_s12 }
  0x1a   :  { %p2517_p11 = scmp.ne.s32.totalorder %s24_s12, %s2516_s30  ;;  %p2522_p13 = scmp.lt.s32.totalorder %s2516_s30, %s2516_s30 }
  0x1c   :  { %p2523_p0 = por %p2522_p13, %p2521_p12 }
  0x1e   :  { %p2524_p1 = pnand %p2523_p0, %p2517_p11 }
  0x20   :  { %2527 = shalt.err (!%p2524_p1)
}
  0x21   :  { %26 = dma.hbm_to_vmem [thread:$0]  %s2953_s0, 128, %s24_s12, [#allocation3]  }
  0x22   :  { %s2568_s11 = smov [#allocation7]   ;;  %s2528_s16 = scalar_lea.hbm %s2955_s2, 128 }
  0x23   :  { %s43_s13 = sshll.u32 %s2568_s11, 4  ;;  %p2529_p2 = scmp.ne.s32.totalorder %s2955_s2, %s2528_s16  ;;  %s44_s13 = int_to_ptr.vmem [resolvable:$true] %s43_s13 }
  0x24   :  { %p2532_p3 = scmp.lt.u32.totalorder %s2528_s16, %s2955_s2 }
  0x26   :  { %p2534_p4 = pnand %p2532_p3, %p2529_p2 }
  0x28   :  { %2537 = shalt.err (!%p2534_p4)
}
  0x29   :  { %s2538_s21 = scalar_lea.vmem %s44_s13, 128  ;;  %p2543_p6 = scmp.lt.s32.totalorder %s44_s13, %s44_s13 }
  0x2a   :  { %p2539_p5 = scmp.ne.s32.totalorder %s44_s13, %s2538_s21  ;;  %p2544_p7 = scmp.lt.s32.totalorder %s2538_s21, %s2538_s21 }
  0x2c   :  { %p2545_p8 = por %p2544_p7, %p2543_p6 }
  0x2e   :  { %p2546_p9 = pnand %p2545_p8, %p2539_p5 }
  0x30   :  { %2549 = shalt.err (!%p2546_p9)
}
  0x31   :  { %46 = dma.hbm_to_vmem [thread:$0]  %s2955_s2, 128, %s44_s13, [#allocation6]  }
  0x32   :  { %2560 = dma.done.wait [#allocation3], 128  }
  0x33   :  { %2561 = vsyncadd [#allocation3], 4294967168 }
  0x34   :  { %2562 = dma.done.wait [#allocation6], 256  }
  0x35   :  { %2563 = vsyncadd [#allocation6], 4294967040  ;;  %v2569_v0 = vmov 0.0|0.0   ;;  %vm2570_vm0 = vmmov 0   ;;  %v2571_v1 = vmov 0.0   ;;  %v2673_v2 = vld [vmem:[#allocation5] sm:$0xff] }
  0x36   :  { %2347 = vmatprep.subr.bf16.mxu0 %v2569_v0  ;;  %2350 = vmatprep.subr.bf16.mxu1 %v2569_v0  ;;  %v68_v3 = vld [vmem:[%s2956_s3] sm:$0xff]  ;;  %v69_v4 = vld [vmem:[%s2956_s3 + $0x8] sm:$0xff]  ;;  %s2572_s25 = smov 8   ;;  %vm105_vm1 = vcmask 64512   ;;  %vm107_vm2 = vcmask 130048   ;;  %v72_v12 = vld [vmem:[%s2958_s5 + $0x10] sm:$0xff] }
  0x37   :  { %2119 = vmatprep.mubr.msk.f32.mxu0 %vm2570_vm0, %v2571_v1  ;;  %2130 = vmatprep.mubr.msk.f32.mxu1 %vm2570_vm0, %v2571_v1  ;;  %v2682_v5 = vpack.c.bf16 %v69_v4, %v68_v3  ;;  %v70_v6 = vld [vmem:[%s2958_s5] sm:$0xff]  ;;  %v71_v7 = vld [vmem:[%s2958_s5 + $0x8] sm:$0xff]  ;;  %v73_v13 = vld [vmem:[%s2958_s5 + $0x18] sm:$0xff]  ;;  %vm182_vm3 = vcmask 261120   ;;  %s2574_s0 = smov 120   ;;  %s2575_s12 = smov 104  }
  0x38   :  { %102 = vrot.lane.b32.xlu0 %v2673_v2, %s2572_s25  ;;  %v2690_v8 = vpack.c.bf16 %v71_v7, %v70_v6  ;;  %v99_v9 = vld [vmem:[#allocation2] sm:$0xff]  ;;  %v2706_v14 = vpack.c.bf16 %v73_v13, %v72_v12  ;;  %v75_v16 = vld [vmem:[%s2960_s7 + $0x8] sm:$0xff]  ;;  %v76_v23 = vld [vmem:[%s2960_s7 + $0x10] sm:$0xff]  ;;  %s2576_s2 = smov 88   ;;  %s2577_s22 = smov 96  }
  0x39   :  { %2349 = vmatpush3.bf16.msra.mxu0 %v2682_v5  ;;  %v74_v15 = vld [vmem:[%s2960_s7] sm:$0xff]  ;;  %v77_v24 = vld [vmem:[%s2960_s7 + $0x18] sm:$0xff]  ;;  %v2780_v40 = vld [vmem:[#allocation7] sm:$0xff]  ;;  %s2578_s23 = smov 80   ;;  %s2579_s24 = smov 72  }
  0x3a   :  { %2352 = vmatpush3.bf16.msra.mxu1 %v2690_v8  ;;  %2356 = vmatprep.subr.bf16.mxu0 %v2569_v0  ;;  %v2716_v17 = vpack.c.bf16 %v75_v16, %v74_v15  ;;  %v2723_v18 = vld [vmem:[%s2957_s4] ss:$0 sm:$0xff]  ;;  %v2737_v25 = vpack.c.bf16 %v77_v24, %v76_v23  ;;  %s2550_s29 = scalar_lea.hbm %s2962_s9, 16 }
  0x3b   :  { %2353 = vmatprep.subr.bf16.mxu1 %v2569_v0  ;;  %v2744_v26 = vld [vmem:[%s2959_s6] ss:$0 sm:$0xff]  ;;  %p2551_p10 = scmp.ne.s32.totalorder %s2962_s9, %s2550_s29  ;;  %p2554_p11 = scmp.lt.u32.totalorder %s2550_s29, %s2962_s9 }
  0x3c   :  { %v2757_v31 = vld [vmem:[%s2961_s8] ss:$0 sm:$0xff]  ;;  %s2573_s8 = smov 112   ;;  %564 = vrot.lane.b32.xlu0 %v2673_v2, %s2574_s0 }
  0x3d   :  { %796 = vrot.lane.b32.xlu1 %v2673_v2, %s2573_s8  ;;  %p2556_p12 = pnand %p2554_p11, %p2551_p10 }
  0x3e   :  { %2355 = vmatpush3.bf16.msra.mxu1 %v2706_v14 }
  0x3f   :  { %2362 = vmatprep.subr.bf16.mxu1 %v2569_v0 }
  0x40   :  { %1260 = vrot.lane.b32.xlu0 %v2673_v2, %s2577_s22 }
  0x41   :  { %1028 = vrot.lane.b32.xlu1 %v2673_v2, %s2575_s12 }
  0x44   :  { %1724 = vrot.lane.b32.xlu0 %v2673_v2, %s2578_s23 }
  0x45   :  { %1492 = vrot.lane.b32.xlu1 %v2673_v2, %s2576_s2 }
  0x48   :  { %789 = vrot.lane.b32.xlu0 %v2780_v40, %s2573_s8 }
  0x49   :  { %557 = vrot.lane.b32.xlu1 %v2780_v40, %s2574_s0 }
  0x4c   :  { %1253 = vrot.lane.b32.xlu0 %v2780_v40, %s2577_s22 }
  0x4d   :  { %1021 = vrot.lane.b32.xlu1 %v2780_v40, %s2575_s12 }
  0x50   :  { %1717 = vrot.lane.b32.xlu0 %v2780_v40, %s2578_s23 }
  0x51   :  { %1485 = vrot.lane.b32.xlu1 %v2780_v40, %s2576_s2 }
  0x55   :  { %1949 = vrot.lane.b32.xlu1 %v2780_v40, %s2579_s24 }
  0xaa   :  { %v103_v10 = vpop.permute.xlu0 %102 }
  0xab   :  { %v106_v11 = vsel %vm105_vm1, %v99_v9, %v103_v10 }
  0xac   :  { %2120 = vmatmul.mubr.msk.f32.vlgmr.msra.gmra.mrb[0].mxu0 %vm107_vm2, %v106_v11 }
  0xad   :  { %2141 = vmatprep.mubr.msk.f32.mxu0 %vm2570_vm0, %v2571_v1  ;;  %2358 = vmatpush3.bf16.msra.mxu0 %v2716_v17 }
  0xae   :  { %2359 = vmatprep.subr.bf16.mxu0 %v2569_v0  ;;  %v565_v50 = vpop.permute.xlu0 %564 }
  0xaf   :  { %v797_v45 = vpop.permute.xlu1 %796 }
  0xb1   :  { %2361 = vmatpush3.bf16.msra.mxu0 %v2737_v25 }
  0xb2   :  { %2365 = vmatprep.subr.bf16.mxu0 %v2569_v0 }
  0xb3   :  { %v2793_v46 = vpop.permute.xlu1 %1028 }
  0xb7   :  { %v2795_v47 = vpop.permute.xlu1 %1492 }
  0xbb   :  { %v558_v48 = vpop.permute.xlu1 %557 }
 0x17f   :  { %v177_v19 = vpop.f32.mrb[0].mxu0 }
 0x180   :  { %v178_v20 = vadd.f32 %v2723_v18, %v177_v19  ;;  %v2121_v21 = vpop.f32.mrb[1].mxu0 }
 0x182   :  { %v181_v22 = vmax.f32 %v178_v20, 0.0 }
 0x184   :  { %2131 = vmatmul.mubr.msk.f32.vlgmr.msra.gmra.mrb[0].mxu1 %vm182_vm3, %v181_v22 }
 0x185   :  { %2364 = vmatpush3.bf16.msra.mxu1 %v2682_v5  ;;  %2148 = vmatprep.mubr.msk.f32.mxu1 %vm2570_vm0, %v2571_v1 }
 0x186   :  { %2371 = vmatprep.subr.bf16.mxu1 %v2569_v0 }
 0x257   :  { %v252_v27 = vpop.f32.mrb[0].mxu1 }
 0x258   :  { %v253_v28 = vadd.f32 %v2744_v26, %v252_v27  ;;  %v2132_v29 = vpop.f32.mrb[1].mxu1 }
 0x25a   :  { %v256_v30 = vmax.f32 %v253_v28, 0.0 }
 0x25c   :  { %2142 = vmatmul.mubr.msk.f32.vlgmr.msra.gmra.mrb[2].mxu0 %vm182_vm3, %v256_v30 }
 0x25d   :  { %2367 = vmatpush3.bf16.msra.mxu0 %v2690_v8  ;;  %2159 = vmatprep.mubr.msk.f32.mxu0 %vm2570_vm0, %v2571_v1 }
 0x25e   :  { %2368 = vmatprep.subr.bf16.mxu0 %v2569_v0 }
 0x261   :  { %2370 = vmatpush3.bf16.msra.mxu0 %v2706_v14 }
 0x262   :  { %2377 = vmatprep.subr.bf16.mxu0 %v2569_v0 }
 0x32f   :  { %v326_v32 = vpop.f32.mrb[2].mxu0 }
 0x330   :  { %v327_v33 = vadd.f32 %v2757_v31, %v326_v32  ;;  %v2143_v34 = vpop.f32.mrb[3].mxu0 }
 0x331   :  { %v1022_v34 = vpop.permute.xlu1 %1021 }
 0x332   :  { %v334_v35 = vsel %vm105_vm1, %v327_v33, %v2673_v2  ;;  %v331_v53 = vsub.f32 %v327_v33, %v2780_v40  ;;  %v2827_v2 = vpop.permute.xlu0 %1260 }
 0x333   :  { %2149 = vmatmul.mubr.msk.f32.vlgmr.msra.gmra.mrb[2].mxu1 %vm107_vm2, %v334_v35 }
 0x334   :  { %2373 = vmatpush3.bf16.msra.mxu1 %v2716_v17  ;;  %2170 = vmatprep.mubr.msk.f32.mxu1 %vm2570_vm0, %v2571_v1  ;;  %v332_v57 = vmul.f32 %v331_v53, %v331_v53 }
 0x335   :  { %2374 = vmatprep.subr.bf16.mxu1 %v2569_v0 }
 0x336   :  { %v2829_v9 = vpop.permute.xlu0 %1724 }
 0x338   :  { %2376 = vmatpush3.bf16.msra.mxu1 %v2737_v25 }
 0x339   :  { %2380 = vmatprep.subr.bf16.mxu1 %v2569_v0 }
 0x33a   :  { %v790_v11 = vpop.permute.xlu0 %789 }
 0x33e   :  { %v1254_v53 = vpop.permute.xlu0 %1253 }
 0x406   :  { %v404_v36 = vpop.f32.mrb[2].mxu1 }
 0x407   :  { %v405_v37 = vadd.f32 %v2723_v18, %v404_v36  ;;  %v2150_v38 = vpop.f32.mrb[3].mxu1 }
 0x409   :  { %v408_v39 = vmax.f32 %v405_v37, 0.0 }
 0x40b   :  { %2160 = vmatmul.mubr.msk.f32.vlgmr.msra.gmra.mrb[4].mxu0 %vm182_vm3, %v408_v39 }
 0x40c   :  { %2379 = vmatpush3.bf16.msra.mxu0 %v2682_v5  ;;  %2177 = vmatprep.mubr.msk.f32.mxu0 %vm2570_vm0, %v2571_v1 }
 0x40d   :  { %2386 = vmatprep.subr.bf16.mxu0 %v2569_v0 }
 0x4de   :  { %v478_v41 = vpop.f32.mrb[4].mxu0 }
 0x4df   :  { %v479_v42 = vadd.f32 %v2744_v26, %v478_v41  ;;  %v2161_v43 = vpop.f32.mrb[5].mxu0 }
 0x4e1   :  { %v482_v44 = vmax.f32 %v479_v42, 0.0 }
 0x4e3   :  { %2171 = vmatmul.mubr.msk.f32.vlgmr.msra.gmra.mrb[4].mxu1 %vm182_vm3, %v482_v44 }
 0x4e4   :  { %2382 = vmatpush3.bf16.msra.mxu1 %v2690_v8  ;;  %2188 = vmatprep.mubr.msk.f32.mxu1 %vm2570_vm0, %v2571_v1 }
 0x4e5   :  { %2383 = vmatprep.subr.bf16.mxu1 %v2569_v0 }
 0x4e8   :  { %2385 = vmatpush3.bf16.msra.mxu1 %v2706_v14 }
 0x4e9   :  { %2392 = vmatprep.subr.bf16.mxu1 %v2569_v0 }
 0x5b6   :  { %v552_v49 = vpop.f32.mrb[4].mxu1 }
 0x5b7   :  { %v553_v51 = vadd.f32 %v2757_v31, %v552_v49  ;;  %v2172_v52 = vpop.f32.mrb[5].mxu1 }
 0x5b9   :  { %v560_v54 = vsub.f32 %v553_v51, %v558_v48  ;;  %v567_v55 = vsel %vm105_vm1, %v553_v51, %v565_v50 }
 0x5ba   :  { %2178 = vmatmul.mubr.msk.f32.vlgmr.msra.gmra.mrb[6].mxu0 %vm107_vm2, %v567_v55 }
 0x5bb   :  { %v561_v56 = vmul.f32 %v560_v54, %v560_v54  ;;  %2388 = vmatpush3.bf16.msra.mxu0 %v2716_v17  ;;  %2199 = vmatprep.mubr.msk.f32.mxu0 %vm2570_vm0, %v2571_v1 }
 0x5bc   :  { %2389 = vmatprep.subr.bf16.mxu0 %v2569_v0 }
 0x5bd   :  { %v562_v58 = vmul.f32 0.99, %v561_v56 }
 0x5bf   :  { %v563_v59 = vadd.f32 %v562_v58, %v332_v57  ;;  %2391 = vmatpush3.bf16.msra.mxu0 %v2737_v25 }
 0x5c0   :  { %2395 = vmatprep.subr.bf16.mxu0 %v2569_v0 }
 0x68d   :  { %v637_v60 = vpop.f32.mrb[6].mxu0 }
 0x68e   :  { %v638_v61 = vadd.f32 %v2723_v18, %v637_v60  ;;  %v2179_v62 = vpop.f32.mrb[7].mxu0 }
 0x690   :  { %v641_v63 = vmax.f32 %v638_v61, 0.0 }
 0x692   :  { %2189 = vmatmul.mubr.msk.f32.vlgmr.msra.gmra.mrb[6].mxu1 %vm182_vm3, %v641_v63 }
 0x693   :  { %2394 = vmatpush3.bf16.msra.mxu1 %v2682_v5  ;;  %2206 = vmatprep.mubr.msk.f32.mxu1 %vm2570_vm0, %v2571_v1 }
 0x694   :  { %2401 = vmatprep.subr.bf16.mxu1 %v2569_v0 }
 0x765   :  { %v711_v3 = vpop.f32.mrb[6].mxu1 }
 0x766   :  { %v712_v4 = vadd.f32 %v2744_v26, %v711_v3  ;;  %v2190_v6 = vpop.f32.mrb[7].mxu1 }
 0x768   :  { %v715_v7 = vmax.f32 %v712_v4, 0.0 }
 0x76a   :  { %2200 = vmatmul.mubr.msk.f32.vlgmr.msra.gmra.mrb[8].mxu0 %vm182_vm3, %v715_v7 }
 0x76b   :  { %2397 = vmatpush3.bf16.msra.mxu0 %v2690_v8  ;;  %2217 = vmatprep.mubr.msk.f32.mxu0 %vm2570_vm0, %v2571_v1 }
 0x76c   :  { %2398 = vmatprep.subr.bf16.mxu0 %v2569_v0 }
 0x76f   :  { %2400 = vmatpush3.bf16.msra.mxu0 %v2706_v14 }
 0x770   :  { %2407 = vmatprep.subr.bf16.mxu0 %v2569_v0 }
 0x83d   :  { %v785_v10 = vpop.f32.mrb[8].mxu0 }
 0x83e   :  { %v786_v12 = vadd.f32 %v2757_v31, %v785_v10  ;;  %v2201_v13 = vpop.f32.mrb[9].mxu0 }
 0x840   :  { %v799_v15 = vsel %vm105_vm1, %v786_v12, %v797_v45  ;;  %v792_v16 = vsub.f32 %v786_v12, %v790_v11  ;;  %v1486_v11 = vpop.permute.xlu1 %1485 }
 0x841   :  { %2207 = vmatmul.mubr.msk.f32.vlgmr.msra.gmra.mrb[8].mxu1 %vm107_vm2, %v799_v15 }
 0x842   :  { %v793_v19 = vmul.f32 %v792_v16, %v792_v16  ;;  %2403 = vmatpush3.bf16.msra.mxu1 %v2716_v17  ;;  %2228 = vmatprep.mubr.msk.f32.mxu1 %vm2570_vm0, %v2571_v1 }
 0x843   :  { %2404 = vmatprep.subr.bf16.mxu1 %v2569_v0 }
 0x844   :  { %v794_v20 = vmul.f32 0.9801, %v793_v19 }
 0x846   :  { %v795_v21 = vadd.f32 %v794_v20, %v563_v59  ;;  %2406 = vmatpush3.bf16.msra.mxu1 %v2737_v25 }
 0x847   :  { %2410 = vmatprep.subr.bf16.mxu1 %v2569_v0 }
 0x914   :  { %v869_v22 = vpop.f32.mrb[8].mxu1 }
 0x915   :  { %v870_v23 = vadd.f32 %v2723_v18, %v869_v22  ;;  %v2208_v24 = vpop.f32.mrb[9].mxu1 }
 0x917   :  { %v873_v27 = vmax.f32 %v870_v23, 0.0 }
 0x919   :  { %2218 = vmatmul.mubr.msk.f32.vlgmr.msra.gmra.mrb[10].mxu0 %vm182_vm3, %v873_v27 }
 0x91a   :  { %2409 = vmatpush3.bf16.msra.mxu0 %v2682_v5  ;;  %2235 = vmatprep.mubr.msk.f32.mxu0 %vm2570_vm0, %v2571_v1 }
 0x91b   :  { %2416 = vmatprep.subr.bf16.mxu0 %v2569_v0 }
 0x9ec   :  { %v943_v28 = vpop.f32.mrb[10].mxu0 }
 0x9ed   :  { %v944_v29 = vadd.f32 %v2744_v26, %v943_v28  ;;  %v2219_v30 = vpop.f32.mrb[11].mxu0 }
 0x9ef   :  { %v947_v32 = vmax.f32 %v944_v29, 0.0 }
 0x9f1   :  { %2229 = vmatmul.mubr.msk.f32.vlgmr.msra.gmra.mrb[10].mxu1 %vm182_vm3, %v947_v32  ;;  %v1718_v32 = vpop.permute.xlu0 %1717 }
 0x9f2   :  { %2412 = vmatpush3.bf16.msra.mxu1 %v2690_v8  ;;  %2246 = vmatprep.mubr.msk.f32.mxu1 %vm2570_vm0, %v2571_v1 }
 0x9f3   :  { %2413 = vmatprep.subr.bf16.mxu1 %v2569_v0 }
 0x9f6   :  { %2415 = vmatpush3.bf16.msra.mxu1 %v2706_v14 }
 0x9f7   :  { %2422 = vmatprep.subr.bf16.mxu1 %v2569_v0 }
 0xac4   :  { %v1017_v33 = vpop.f32.mrb[10].mxu1 }
 0xac5   :  { %v1018_v35 = vadd.f32 %v2757_v31, %v1017_v33  ;;  %v2230_v36 = vpop.f32.mrb[11].mxu1 }
 0xac7   :  { %v1031_v37 = vsel %vm105_vm1, %v1018_v35, %v2793_v46  ;;  %v1024_v38 = vsub.f32 %v1018_v35, %v1022_v34 }
 0xac8   :  { %2236 = vmatmul.mubr.msk.f32.vlgmr.msra.gmra.mrb[12].mxu0 %vm107_vm2, %v1031_v37 }
 0xac9   :  { %v1025_v39 = vmul.f32 %v1024_v38, %v1024_v38  ;;  %2418 = vmatpush3.bf16.msra.mxu0 %v2716_v17  ;;  %2257 = vmatprep.mubr.msk.f32.mxu0 %vm2570_vm0, %v2571_v1 }
 0xaca   :  { %2419 = vmatprep.subr.bf16.mxu0 %v2569_v0 }
 0xacb   :  { %v1026_v41 = vmul.f32 0.970299, %v1025_v39 }
 0xacd   :  { %v1027_v42 = vadd.f32 %v1026_v41, %v795_v21  ;;  %2421 = vmatpush3.bf16.msra.mxu0 %v2737_v25 }
 0xace   :  { %2425 = vmatprep.subr.bf16.mxu0 %v2569_v0 }
 0xb9b   :  { %v1101_v43 = vpop.f32.mrb[12].mxu0 }
 0xb9c   :  { %v1102_v44 = vadd.f32 %v2723_v18, %v1101_v43  ;;  %v2237_v45 = vpop.f32.mrb[13].mxu0 }
 0xb9e   :  { %v1105_v46 = vmax.f32 %v1102_v44, 0.0  ;;  %v1950_v44 = vpop.permute.xlu1 %1949 }
 0xba0   :  { %2247 = vmatmul.mubr.msk.f32.vlgmr.msra.gmra.mrb[12].mxu1 %vm182_vm3, %v1105_v46 }
 0xba1   :  { %2424 = vmatpush3.bf16.msra.mxu1 %v2682_v5  ;;  %2264 = vmatprep.mubr.msk.f32.mxu1 %vm2570_vm0, %v2571_v1 }
 0xba2   :  { %2431 = vmatprep.subr.bf16.mxu1 %v2569_v0 }
 0xc73   :  { %v1175_v48 = vpop.f32.mrb[12].mxu1 }
 0xc74   :  { %v1176_v49 = vadd.f32 %v2744_v26, %v1175_v48  ;;  %v2248_v50 = vpop.f32.mrb[13].mxu1 }
 0xc76   :  { %v1179_v51 = vmax.f32 %v1176_v49, 0.0 }
 0xc78   :  { %2258 = vmatmul.mubr.msk.f32.vlgmr.msra.gmra.mrb[14].mxu0 %vm182_vm3, %v1179_v51 }
 0xc79   :  { %2427 = vmatpush3.bf16.msra.mxu0 %v2690_v8  ;;  %2275 = vmatprep.mubr.msk.f32.mxu0 %vm2570_vm0, %v2571_v1 }
 0xc7a   :  { %2428 = vmatprep.subr.bf16.mxu0 %v2569_v0 }
 0xc7d   :  { %2430 = vmatpush3.bf16.msra.mxu0 %v2706_v14 }
 0xc7e   :  { %2437 = vmatprep.subr.bf16.mxu0 %v2569_v0 }
 0xd4b   :  { %v1249_v52 = vpop.f32.mrb[14].mxu0 }
 0xd4c   :  { %v1250_v54 = vadd.f32 %v2757_v31, %v1249_v52  ;;  %v2259_v55 = vpop.f32.mrb[15].mxu0 }
 0xd4e   :  { %v1263_v56 = vsel %vm105_vm1, %v1250_v54, %v2827_v2  ;;  %v1256_v57 = vsub.f32 %v1250_v54, %v1254_v53 }
 0xd4f   :  { %2265 = vmatmul.mubr.msk.f32.vlgmr.msra.gmra.mrb[14].mxu1 %vm107_vm2, %v1263_v56 }
 0xd50   :  { %v1257_v58 = vmul.f32 %v1256_v57, %v1256_v57  ;;  %2433 = vmatpush3.bf16.msra.mxu1 %v2716_v17  ;;  %2286 = vmatprep.mubr.msk.f32.mxu1 %vm2570_vm0, %v2571_v1 }
 0xd51   :  { %2434 = vmatprep.subr.bf16.mxu1 %v2569_v0 }
 0xd52   :  { %v1258_v59 = vmul.f32 0.960596, %v1257_v58 }
 0xd54   :  { %v1259_v60 = vadd.f32 %v1258_v59, %v1027_v42  ;;  %2436 = vmatpush3.bf16.msra.mxu1 %v2737_v25 }
 0xd55   :  { %2440 = vmatprep.subr.bf16.mxu1 %v2569_v0 }
 0xe22   :  { %v1333_v61 = vpop.f32.mrb[14].mxu1 }
 0xe23   :  { %v1334_v62 = vadd.f32 %v2723_v18, %v1333_v61  ;;  %v2266_v63 = vpop.f32.mrb[15].mxu1 }
 0xe25   :  { %v1337_v3 = vmax.f32 %v1334_v62, 0.0 }
 0xe27   :  { %2276 = vmatmul.mubr.msk.f32.vlgmr.msra.gmra.mrb[16].mxu0 %vm182_vm3, %v1337_v3 }
 0xe28   :  { %2439 = vmatpush3.bf16.msra.mxu0 %v2682_v5  ;;  %2293 = vmatprep.mubr.msk.f32.mxu0 %vm2570_vm0, %v2571_v1 }
 0xe29   :  { %2446 = vmatprep.subr.bf16.mxu0 %v2569_v0 }
 0xefa   :  { %v1407_v4 = vpop.f32.mrb[16].mxu0 }
 0xefb   :  { %v1408_v6 = vadd.f32 %v2744_v26, %v1407_v4  ;;  %v2277_v7 = vpop.f32.mrb[17].mxu0 }
 0xefd   :  { %v1411_v2 = vmax.f32 %v1408_v6, 0.0 }
 0xeff   :  { %2287 = vmatmul.mubr.msk.f32.vlgmr.msra.gmra.mrb[16].mxu1 %vm182_vm3, %v1411_v2 }
 0xf00   :  { %2442 = vmatpush3.bf16.msra.mxu1 %v2690_v8  ;;  %2304 = vmatprep.mubr.msk.f32.mxu1 %vm2570_vm0, %v2571_v1 }
 0xf01   :  { %2443 = vmatprep.subr.bf16.mxu1 %v2569_v0 }
 0xf04   :  { %2445 = vmatpush3.bf16.msra.mxu1 %v2706_v14 }
 0xf05   :  { %2452 = vmatprep.subr.bf16.mxu1 %v2569_v0 }
 0xfd2   :  { %v1481_v10 = vpop.f32.mrb[16].mxu1 }
 0xfd3   :  { %v1482_v12 = vadd.f32 %v2757_v31, %v1481_v10  ;;  %v2288_v13 = vpop.f32.mrb[17].mxu1 }
 0xfd5   :  { %v1495_v15 = vsel %vm105_vm1, %v1482_v12, %v2795_v47  ;;  %v1488_v16 = vsub.f32 %v1482_v12, %v1486_v11 }
 0xfd6   :  { %2294 = vmatmul.mubr.msk.f32.vlgmr.msra.gmra.mrb[18].mxu0 %vm107_vm2, %v1495_v15 }
 0xfd7   :  { %v1489_v19 = vmul.f32 %v1488_v16, %v1488_v16  ;;  %2448 = vmatpush3.bf16.msra.mxu0 %v2716_v17  ;;  %2315 = vmatprep.mubr.msk.f32.mxu0 %vm2570_vm0, %v2571_v1 }
 0xfd8   :  { %2449 = vmatprep.subr.bf16.mxu0 %v2569_v0 }
 0xfd9   :  { %v1490_v20 = vmul.f32 0.95099, %v1489_v19 }
 0xfdb   :  { %v1491_v21 = vadd.f32 %v1490_v20, %v1259_v60  ;;  %2451 = vmatpush3.bf16.msra.mxu0 %v2737_v25 }
 0xfdc   :  { %2455 = vmatprep.subr.bf16.mxu0 %v2569_v0 }
0x10a9   :  { %v1565_v22 = vpop.f32.mrb[18].mxu0 }
0x10aa   :  { %v1566_v47 = vadd.f32 %v2723_v18, %v1565_v22  ;;  %v2295_v23 = vpop.f32.mrb[19].mxu0 }
0x10ac   :  { %v1569_v24 = vmax.f32 %v1566_v47, 0.0 }
0x10ae   :  { %2305 = vmatmul.mubr.msk.f32.vlgmr.msra.gmra.mrb[18].mxu1 %vm182_vm3, %v1569_v24 }
0x10af   :  { %2454 = vmatpush3.bf16.msra.mxu1 %v2682_v5  ;;  %2322 = vmatprep.mubr.msk.f32.mxu1 %vm2570_vm0, %v2571_v1 }
0x10b0   :  { %2461 = vmatprep.subr.bf16.mxu1 %v2569_v0 }
0x1181   :  { %v1639_v27 = vpop.f32.mrb[18].mxu1 }
0x1182   :  { %v1640_v28 = vadd.f32 %v2744_v26, %v1639_v27  ;;  %v2306_v29 = vpop.f32.mrb[19].mxu1 }
0x1184   :  { %v1643_v30 = vmax.f32 %v1640_v28, 0.0 }
0x1186   :  { %2316 = vmatmul.mubr.msk.f32.vlgmr.msra.gmra.mrb[20].mxu0 %vm182_vm3, %v1643_v30 }
0x1187   :  { %2457 = vmatpush3.bf16.msra.mxu0 %v2690_v8  ;;  %2333 = vmatprep.mubr.msk.f32.mxu0 %vm2570_vm0, %v2571_v1 }
0x1188   :  { %2458 = vmatprep.subr.bf16.mxu0 %v2569_v0 }
0x118b   :  { %2460 = vmatpush3.bf16.msra.mxu0 %v2706_v14 }
0x1259   :  { %v1713_v5 = vpop.f32.mrb[20].mxu0 }
0x125a   :  { %v1714_v33 = vadd.f32 %v2757_v31, %v1713_v5  ;;  %v2317_v34 = vpop.f32.mrb[21].mxu0 }
0x125c   :  { %v1727_v35 = vsel %vm105_vm1, %v1714_v33, %v2829_v9  ;;  %v1720_v36 = vsub.f32 %v1714_v33, %v1718_v32 }
0x125d   :  { %2323 = vmatmul.mubr.msk.f32.vlgmr.msra.gmra.mrb[20].mxu1 %vm107_vm2, %v1727_v35 }
0x125e   :  { %v1721_v37 = vmul.f32 %v1720_v36, %v1720_v36  ;;  %2463 = vmatpush3.bf16.msra.mxu1 %v2716_v17  ;;  %2344 = vmatprep.mubr.msk.f32.mxu1 %vm2570_vm0, %v2571_v1 }
0x125f   :  { %2464 = vmatprep.subr.bf16.mxu1 %v2569_v0 }
0x1260   :  { %v1722_v8 = vmul.f32 0.94148016, %v1721_v37 }
0x1262   :  { %v1723_v14 = vadd.f32 %v1722_v8, %v1491_v21  ;;  %2466 = vmatpush3.bf16.msra.mxu1 %v2737_v25 }
0x1330   :  { %v1797_v38 = vpop.f32.mrb[20].mxu1 }
0x1331   :  { %v1798_v39 = vadd.f32 %v2723_v18, %v1797_v38  ;;  %v2324_v41 = vpop.f32.mrb[21].mxu1 }
0x1333   :  { %v1801_v9 = vmax.f32 %v1798_v39, 0.0 }
0x1335   :  { %2334 = vmatmul.mubr.msk.f32.vlgmr.msra.gmra.mrb[22].mxu0 %vm182_vm3, %v1801_v9 }
0x1408   :  { %v1871_v17 = vpop.f32.mrb[22].mxu0 }
0x1409   :  { %v1872_v42 = vadd.f32 %v2744_v26, %v1871_v17  ;;  %v2335_v1 = vpop.f32.mrb[23].mxu0 }
0x140b   :  { %v1875_v43 = vmax.f32 %v1872_v42, 0.0 }
0x140d   :  { %2345 = vmatmul.mubr.msk.f32.vlgmr.msra.gmra.mrb[22].mxu1 %vm182_vm3, %v1875_v43 }
0x14e0   :  { %v1945_v0 = vpop.f32.mrb[22].mxu1 }
0x14e1   :  { %v1946_v25 = vadd.f32 %v2757_v31, %v1945_v0  ;;  %v2346_v45 = vpop.f32.mrb[23].mxu1 }
0x14e3   :  { %v1952_v18 = vsub.f32 %v1946_v25, %v1950_v44 }
0x14e5   :  { %v1953_v46 = vmul.f32 %v1952_v18, %v1952_v18 }
0x14e7   :  { %v1954_v48 = vmul.f32 0.93206537, %v1953_v46 }
0x14e9   :  { %v1955_v49 = vadd.f32 %v1954_v48, %v1723_v14 }
0x14eb   :  { %v1956_v50 = vsel %vm105_vm1, %v1955_v49, 0.0 }
0x14ec   :  { %1957 = vadd.xlane.f32.xlu0 %v1956_v50 }
0x1579   :  { %v1958_v40 = vpop.xlane.xlu0 %1957 }
0x157a   :  { %v1959_v51 = vrot.slane %v1958_v40, 4 }
0x157c   :  { %v1960_v52 = vadd.f32 %v1959_v51, %v1958_v40 }
0x157e   :  { %v1961_v26 = vrot.slane %v1960_v52, 2 }
0x1580   :  { %v1962_v53 = vadd.f32 %v1961_v26, %v1960_v52 }
0x1582   :  { %v1963_v54 = vrot.slane %v1962_v53, 1 }
0x1584   :  { %v1964_v55 = vadd.f32 %v1963_v54, %v1962_v53 }
0x1586   :  { %2467 = vpush %v1964_v55 }
0x15b7   :  { %s2468_s25 = spop %2467 }
0x15b8   :  { %s1966_s26 = smul.f32 0.015625, %s2468_s25 }
0x15ba   :  { %1968 = sst [smem:[#allocation8]] %s1966_s26 }
0x15bb   :  { %2559 = shalt.err (!%p2556_p12)
}
0x15bc   :  { %s2580_s11 = smov [#allocation8]  }
0x15bd   :  { %1976 = dma.smem_to_hbm %s2580_s11, 16, %s2962_s9, [#allocation4]  }
0x15be   :  { %2564 = dma.done.wait [#allocation4], 16  }
0x15bf   :  { %2565 = vsyncadd [#allocation4], 4294967280 }
0x15c0   :  { %1980 = sfence }
0x15c1   :  { %1981 = vsyncpa [#allocation3], 1 }
0x15c2   :  { %1982 = vsyncpa [#allocation6], 1 }
0x15c3   :  { %1983 = vsyncpa [#allocation4], 1 }

</bundles_post_ra>
